<compile_context>
chip_gen: v7x
topology: tpu7x:2x2x1
jax: 0.10.0
libtpu: 0.0.40
codegen_flags: <defaults>
</compile_context>

<pallas_src>
import math

import jax
import jax.numpy as jnp
from jax.experimental import pallas as pl
from jax.experimental.pallas import tpu as pltpu


def _group_kan_kernel(x_ref, w_ref, c_ref, o_ref):
    """One grid step = (row tile) x (output-column tile), all groups fused.

    x_ref : (tile_n, in_features)       VMEM
    w_ref : (in_features, tile_out)     VMEM  block-diagonal group weights
    c_ref : (8, tile_out)               VMEM  row 0: bias, 1-4: p0..p3, 5-7: q0..q2
    o_ref : (tile_n, tile_out)          VMEM
    """
    w = w_ref[...]
    x = x_ref[...].astype(w.dtype)    # no-op for f32; enables bf16 MXU path
    c = c_ref[...]

    # Fused group Linear: block-diagonal weight keeps groups independent.
    y = jnp.dot(x, w, preferred_element_type=jnp.float32) + c[0:1, :]

    p0, p1, p2, p3 = c[1:2, :], c[2:3, :], c[3:4, :], c[4:5, :]
    q0, q1, q2 = c[5:6, :], c[6:7, :], c[7:8, :]

    # Rational activation P3(y) / (1 + |Q3(y)|), Horner form on the VPU.
    num = p0 + y * (p1 + y * (p2 + y * p3))
    den = 1.0 + jnp.abs(y * (q0 + y * (q1 + y * q2)))
    # Divide -> EUP reciprocal (approx): moves work off the binding VALU slots.
    o_ref[...] = (num * pl.reciprocal(den, approx=True)).astype(o_ref.dtype)


def _round_up(x, m):
    return ((x + m - 1) // m) * m


def _vmem_budget_and_limit():
    """Generation-aware scoped-VMEM limit and the tile budget derived from it."""
    try:
        cap = pltpu.get_tpu_info().vmem_capacity_bytes   # 128 MiB v5e/v6e, 64 MiB v7x
    except Exception:                                    # no device info available
        cap = 64 * 1024 * 1024                           # conservative (v7x per-TC)
    limit = min(cap // 2, 64 * 1024 * 1024)              # scoped limit we request
    budget = (limit * 3) // 4                            # headroom for internal scratch
    return budget, limit


def _pick_tile_out(out_features):
    """Lane-dense column tile; full width when small, <=1024-lane slabs when large."""
    if out_features <= 1024:
        return out_features
    for t in (1024, 896, 768, 640, 512, 384, 256, 128):
        if out_features % t == 0:
            return t
    return out_features


def _pick_tile_n(n_rows, in_features, tile_out, c_steps, budget, row_align, w_itemsize):
    """Largest row tile whose double-buffered working set fits the VMEM budget."""
    w_buffers = 1 if c_steps == 1 else 2                 # Buffered(1) when grid-invariant
    w_bytes = in_features * tile_out * w_itemsize * w_buffers
    coef_bytes = 8 * tile_out * 4 * w_buffers
    per_row = (in_features + tile_out) * 4 * 2           # double-buffered x + out (f32)
    tile = (budget - w_bytes - coef_bytes) // max(per_row, 1)
    tile = max(row_align, min(1024, tile))
    tile = (tile // row_align) * row_align
    # Keep ~8 total grid steps so megacore / both v7x TensorCores get work and the
    # DMA pipeline overlaps compute even for small N; extra steps cost ~0.35 us each.
    min_total_steps = 8
    n_steps_target = max(1, pl.cdiv(min_total_steps, c_steps))
    tile = min(tile, _round_up(pl.cdiv(n_rows, n_steps_target), row_align))
    return max(row_align, tile)


def _grid_invariant_spec(shape, index_map):
    """Single-buffered BlockSpec for blocks whose index never changes."""
    try:
        return pl.BlockSpec(shape, index_map, pipeline_mode=pl.Buffered(1))
    except Exception:   # older jax without pipeline_mode / Buffered support
        return pl.BlockSpec(shape, index_map)


def group_kan_forward(x, weight, bias, p_coef, q_coef, *, mxu_input_dtype=None):
    """GroupKANLayer forward.

    x      : (..., in_features)
    weight : (G, g_in, g_out)   -- per-group Linear weight, already transposed
    bias   : (G, g_out)
    p_coef : (G, 4)
    q_coef : (G, 3)
    mxu_input_dtype : optional (e.g. jnp.bfloat16) for the MXU fast path.
    returns (..., out_features) with out_features = G * g_out
    """
    G, gin, gout = weight.shape
    in_features = G * gin
    out_features = G * gout
    lead = x.shape[:-1]
    N = math.prod(lead) if lead else 1
    assert x.shape[-1] == in_features

    # --- fused parameters (trace-time, tiny) ---------------------------------
    # Exact block-diagonal weight, scatter-free: one broadcast-multiply with the
    # identity (off-diagonal blocks are exact zeros -> no cross-group leakage).
    eye = jnp.eye(G, dtype=weight.dtype)
    w_bd = (weight[:, :, None, :] * eye[:, None, :, None]).reshape(
        in_features, out_features)
    if mxu_input_dtype is not None:
        w_bd = w_bd.astype(mxu_input_dtype)

    # Per-output-lane coefficient rows: lane j belongs to group j // gout.
    bias_lanes = bias.reshape(1, out_features).astype(jnp.float32)
    p_lanes = jnp.repeat(p_coef.T.astype(jnp.float32), gout, axis=1)   # (4, out)
    q_lanes = jnp.repeat(q_coef.T.astype(jnp.float32), gout, axis=1)   # (3, out)
    coef = jnp.concatenate([bias_lanes, p_lanes, q_lanes], axis=0)     # (8, out)

    # --- tiling ---------------------------------------------------------------
    x2 = x.reshape(N, in_features)
    row_align = {4: 8, 2: 16, 1: 32}.get(jnp.dtype(x2.dtype).itemsize, 8)

    budget, vmem_limit = _vmem_budget_and_limit()
    tile_out = _pick_tile_out(out_features)
    c_steps = pl.cdiv(out_features, tile_out)
    tile_n = _pick_tile_n(N, in_features, tile_out, c_steps, budget, row_align,
                          jnp.dtype(w_bd.dtype).itemsize)
    n_steps = pl.cdiv(N, tile_n)

    # Column blocks outer (weight slab reused across all row blocks), row blocks
    # inner.  No wrapper-side padding: Pallas masks the ragged last row block
    # (garbage tail rows are harmless since den >= 1 and they are never written).
    grid = (c_steps, n_steps)

    w_shape, w_idx = (in_features, tile_out), (lambda c, n: (0, c))
    c_shape, c_idx = (8, tile_out), (lambda c, n: (0, c))
    if c_steps == 1:
        # Grid-invariant blocks: single VMEM buffer instead of double-buffering.
        w_spec = _grid_invariant_spec(w_shape, w_idx)
        c_spec = _grid_invariant_spec(c_shape, c_idx)
    else:
        w_spec = pl.BlockSpec(w_shape, w_idx)
        c_spec = pl.BlockSpec(c_shape, c_idx)

    out = pl.pallas_call(
        _group_kan_kernel,
        grid=grid,
        in_specs=[
            pl.BlockSpec((tile_n, in_features), lambda c, n: (n, 0)),
            w_spec,
            c_spec,
        ],
        out_specs=pl.BlockSpec((tile_n, tile_out), lambda c, n: (n, c)),
        out_shape=jax.ShapeDtypeStruct((N, out_features), x.dtype),
        compiler_params=pltpu.CompilerParams(
            dimension_semantics=("parallel", "parallel"),
            vmem_limit_bytes=vmem_limit),
    )(x2, w_bd, coef)

    return out.reshape(*lead, out_features)


def group_kan_reference(x, weight, bias, p_coef, q_coef):
    """Pure-JAX reference mirroring the PyTorch module."""
    G, gin, gout = weight.shape
    chunks = jnp.split(x, G, axis=-1)
    outs = []
    for g in range(G):
        y = chunks[g] @ weight[g] + bias[g]
        p = p_coef[g]
        q = q_coef[g]
        num = p[0] + p[1] * y + p[2] * y**2 + p[3] * y**3
        den = 1.0 + jnp.abs(q[0] * y + q[1] * y**2 + q[2] * y**3)
        outs.append(num / den)
    return jnp.concatenate(outs, axis=-1)


if __name__ == "__main__":
    # Small shapes consistent with the module: batch=2, seq=8, hidden=32, 8 groups.
    batch, seq = 2, 8
    in_features, out_features, num_groups = 32, 32, 8
    gin = in_features // num_groups
    gout = out_features // num_groups

    key = jax.random.PRNGKey(0)
    kx, kw, kb, kp, kq = jax.random.split(key, 5)

    x = jax.random.normal(kx, (batch, seq, in_features), dtype=jnp.float32)

    # Per-group Linear params (uniform init like nn.Linear default).
    bound = 1.0 / math.sqrt(gin)
    weight = jax.random.uniform(
        kw, (num_groups, gin, gout), minval=-bound, maxval=bound,
        dtype=jnp.float32)
    bias = jax.random.uniform(
        kb, (num_groups, gout), minval=-bound, maxval=bound, dtype=jnp.float32)

    # RationalActivation init (p=[1,0,0,0], q=[1,0,0]) plus a small perturbation
    # so the full rational path is exercised.
    p_coef = (jnp.tile(jnp.array([1.0, 0.0, 0.0, 0.0], jnp.float32), (num_groups, 1))
              + 0.05 * jax.random.normal(kp, (num_groups, 4), dtype=jnp.float32))
    q_coef = (jnp.tile(jnp.array([1.0, 0.0, 0.0], jnp.float32), (num_groups, 1))
              + 0.05 * jax.random.normal(kq, (num_groups, 3), dtype=jnp.float32))

    out = group_kan_forward(x, weight, bias, p_coef, q_coef)
    out = jax.block_until_ready(out)

    ref = group_kan_reference(x, weight, bias, p_coef, q_coef)
    assert out.shape == (batch, seq, out_features)
    # Tolerance relaxed vs 1e-5 because the divide now uses the EUP approximate
    # reciprocal (rel. error ~1e-4); everything else is f32.
    assert jnp.allclose(out, ref, atol=2e-3, rtol=2e-3), "mismatch vs reference"

    print("KERNEL_OK")
</pallas_src>

<mosaic_0001>
module attributes {stable_mosaic.version = 11 : i64} {
  func.func @_group_kan_kernel(%arg0: i32, %arg1: i32, %arg2: memref<8x32xf32, #tpu.memory_space<vmem>>, %arg3: memref<32x32xf32, #tpu.memory_space<vmem>>, %arg4: memref<8x32xf32, #tpu.memory_space<vmem>>, %arg5: memref<8x32xf32, #tpu.memory_space<vmem>>) attributes {dimension_semantics = [#tpu.dimension_semantics<parallel>, #tpu.dimension_semantics<parallel>], iteration_bounds = array<i64: 1, 2>, scalar_prefetch = 0 : i64, scratch_operands = 0 : i64, tpu.core_type = #tpu.core_type<tc>, window_params = [{transform_indices = @transform_0, window_bounds = array<i64: 8, 32>}, {pipeline_mode = #tpu.pipeline_mode<synchronous>, transform_indices = @transform_1, window_bounds = array<i64: 32, 32>}, {pipeline_mode = #tpu.pipeline_mode<synchronous>, transform_indices = @transform_2, window_bounds = array<i64: 8, 32>}, {transform_indices = @transform_3, window_bounds = array<i64: 8, 32>}]} {
    %c0 = arith.constant 0 : index
    %c0_0 = arith.constant 0 : index
    %0 = vector.load %arg3[%c0, %c0_0] : memref<32x32xf32, #tpu.memory_space<vmem>>, vector<32x32xf32>
    %c0_1 = arith.constant 0 : index
    %c0_2 = arith.constant 0 : index
    %1 = vector.load %arg2[%c0_1, %c0_2] : memref<8x32xf32, #tpu.memory_space<vmem>>, vector<8x32xf32>
    %c0_3 = arith.constant 0 : index
    %c0_4 = arith.constant 0 : index
    %2 = vector.load %arg4[%c0_3, %c0_4] : memref<8x32xf32, #tpu.memory_space<vmem>>, vector<8x32xf32>
    %cst = arith.constant dense<0.000000e+00> : vector<8x32xf32>
    %3 = tpu.matmul %1, %0, %cst {dimension_numbers = #tpu.dot_dimension_numbers<[1], [0], [0], [1], [0, 0, 1, 1], [], []>} : vector<8x32xf32>, vector<32x32xf32>, vector<8x32xf32> -> vector<8x32xf32>
    %4 = vector.extract_strided_slice %2 {offsets = [0, 0], sizes = [1, 32], strides = [1, 1]} : vector<8x32xf32> to vector<1x32xf32>
    %5 = vector.broadcast %4 : vector<1x32xf32> to vector<8x32xf32>
    %6 = arith.addf %3, %5 : vector<8x32xf32>
    %7 = vector.extract_strided_slice %2 {offsets = [1, 0], sizes = [1, 32], strides = [1, 1]} : vector<8x32xf32> to vector<1x32xf32>
    %8 = vector.extract_strided_slice %2 {offsets = [2, 0], sizes = [1, 32], strides = [1, 1]} : vector<8x32xf32> to vector<1x32xf32>
    %9 = vector.extract_strided_slice %2 {offsets = [3, 0], sizes = [1, 32], strides = [1, 1]} : vector<8x32xf32> to vector<1x32xf32>
    %10 = vector.extract_strided_slice %2 {offsets = [4, 0], sizes = [1, 32], strides = [1, 1]} : vector<8x32xf32> to vector<1x32xf32>
    %11 = vector.extract_strided_slice %2 {offsets = [5, 0], sizes = [1, 32], strides = [1, 1]} : vector<8x32xf32> to vector<1x32xf32>
    %12 = vector.extract_strided_slice %2 {offsets = [6, 0], sizes = [1, 32], strides = [1, 1]} : vector<8x32xf32> to vector<1x32xf32>
    %13 = vector.extract_strided_slice %2 {offsets = [7, 0], sizes = [1, 32], strides = [1, 1]} : vector<8x32xf32> to vector<1x32xf32>
    %14 = vector.broadcast %10 : vector<1x32xf32> to vector<8x32xf32>
    %15 = arith.mulf %6, %14 : vector<8x32xf32>
    %16 = vector.broadcast %9 : vector<1x32xf32> to vector<8x32xf32>
    %17 = arith.addf %16, %15 : vector<8x32xf32>
    %18 = arith.mulf %6, %17 : vector<8x32xf32>
    %19 = vector.broadcast %8 : vector<1x32xf32> to vector<8x32xf32>
    %20 = arith.addf %19, %18 : vector<8x32xf32>
    %21 = arith.mulf %6, %20 : vector<8x32xf32>
    %22 = vector.broadcast %7 : vector<1x32xf32> to vector<8x32xf32>
    %23 = arith.addf %22, %21 : vector<8x32xf32>
    %24 = vector.broadcast %13 : vector<1x32xf32> to vector<8x32xf32>
    %25 = arith.mulf %6, %24 : vector<8x32xf32>
    %26 = vector.broadcast %12 : vector<1x32xf32> to vector<8x32xf32>
    %27 = arith.addf %26, %25 : vector<8x32xf32>
    %28 = arith.mulf %6, %27 : vector<8x32xf32>
    %29 = vector.broadcast %11 : vector<1x32xf32> to vector<8x32xf32>
    %30 = arith.addf %29, %28 : vector<8x32xf32>
    %31 = arith.mulf %6, %30 : vector<8x32xf32>
    %32 = math.absf %31 : vector<8x32xf32>
    %cst_5 = arith.constant 1.000000e+00 : f32
    %33 = vector.broadcast %cst_5 : f32 to vector<8x32xf32>
    %34 = arith.addf %33, %32 : vector<8x32xf32>
    %35 = tpu.reciprocal %34 {approx = true} : vector<8x32xf32> -> vector<8x32xf32>
    %36 = arith.mulf %23, %35 : vector<8x32xf32>
    %c0_6 = arith.constant 0 : index
    %c0_7 = arith.constant 0 : index
    %37 = vector.load %arg5[%c0_6, %c0_7] : memref<8x32xf32, #tpu.memory_space<vmem>>, vector<8x32xf32>
    tpu.vector_store %arg5[%c0_6, %c0_7], %36 {strides = array<i32>} : memref<8x32xf32, #tpu.memory_space<vmem>>, vector<8x32xf32>,
    return
  }
  func.func @transform_0(%arg0: i32, %arg1: i32) -> (i32, i32) {
    %c0_i32 = arith.constant 0 : i32
    %c0_i32_0 = arith.constant 0 : i32
    return %arg1, %c0_i32 : i32, i32
  }
  func.func @transform_1(%arg0: i32, %arg1: i32) -> (i32, i32) {
    %c0_i32 = arith.constant 0 : i32
    %c0_i32_0 = arith.constant 0 : i32
    return %c0_i32, %arg0 : i32, i32
  }
  func.func @transform_2(%arg0: i32, %arg1: i32) -> (i32, i32) {
    %c0_i32 = arith.constant 0 : i32
    %c0_i32_0 = arith.constant 0 : i32
    return %c0_i32, %arg0 : i32, i32
  }
  func.func @transform_3(%arg0: i32, %arg1: i32) -> (i32, i32) {
    %c0_i32 = arith.constant 0 : i32
    return %arg1, %arg0 : i32, i32
  }
}

</mosaic_0001>

<bundles_post_ra>
// kernel: tpu_custom_call.1
= control target key start
LH: loop header
LB: loop body
LE: loop exit
PB: predicated region body
PF: predicated region fallthrough
CT: control target
= control target key end

     0   :  { %8 = vsyncpa [#allocation3], 0  ;;  %s1075_s0 = inlined_call_operand.hbm [shape: f32[16,32], index: 0, kind: input, shape index: {}]   ;;  %s1076_s1 = inlined_call_operand.hbm [shape: f32[32,32], index: 1, kind: input, shape index: {}]   ;;  %s1077_s2 = inlined_call_operand.hbm [shape: f32[8,32], index: 2, kind: input, shape index: {}]   ;;  %s1078_s3 = inlined_call_operand.hbm [shape: f32[16,32], index: 3, kind: output, shape index: {}]  }
   0x1   :  { %10 = vsyncpa [#allocation3 + $0x1], 0 }
   0x2   :  { %11 = vsyncpa [#allocation6], 0 }
   0x3   :  { %12 = vsyncpa [#allocation4], 0 }
   0x4   :  { %14 = vsyncpa [#allocation4 + $0x1], 0  ;;  %s819_s12 = smov 0   ;;  %s821_s13 = smov 0  }
   0x5   :  { %s823_s14 = smov 0   ;;  %s825_s15 = smov 0  }
   0x6   :  { %s827_s16 = smov 0   ;;  %s829_s17 = smov 0  }
   0x7 LB: > { %s486_s18 = sadd.s32 4294967295, %s788_s17   ;;  %s487_s19 = sadd.s32 4294967294, %s788_s17   ;;  %s788_s17 = sphi %s829_s17, %s20_s17   ;;  %s784_s16 = sphi %s827_s16, %s1100_s16   ;;  %s780_s15 = sphi %s825_s15, %s1099_s15   ;;  %s776_s14 = sphi %s823_s14, %s1098_s14   ;;  %s772_s13 = sphi %s821_s13, %s1097_s13   ;;  %s768_s12 = sphi %s819_s12, %s1096_s12  }
   0x8   : > { %p52_p0 = scmp.ne.s32.totalorder %s772_s13, %s768_s12  ;;  %p853_p1 = scmp.eq.s32.totalorder %s486_s18, 0 }
   0x9   : > { %p857_p2 = scmp.eq.s32.totalorder %s486_s18, 1  ;;  %p136_p3 = scmp.eq.s32.totalorder %s487_s19, 1 }
   0xa   : > { %s1083_s20 = scalar_select %p853_p1, 1, 0 }
   0xb   : > { %p863_p4 = por %p853_p1, %p52_p0  ;;  %p488_p5 = scmp.ge.s32.totalorder %s788_s17, 1 }
   0xc   : > { %p868_p6 = por %p136_p3, %p52_p0  ;;  %p143_p7 = scmp.lt.s32.totalorder %s788_s17, 3 }
   0xd   : > { %s1085_s22 = scalar_select %p863_p4, 1, 0 }
   0xe   : > { %s1086_s23 = scalar_select %p868_p6, 1, 0 }
   0xf   : > { %p873_p8 = pnand %p488_p5, %p143_p7  ;;  %s790_s25 = smov [#allocation5]  }
  0x10   : > { %s157_s26 = sshll.u32 %s790_s25, 4  ;;  %s791_s28 = smov [#allocation7]   ;;  %s877_s26 = int_to_ptr.vmem [resolvable:$true] %s157_s26 }
  0x11   : > { %p538_p9 = pneg %p873_p8  ;;  %s173_s29 = sshll.u32 %s791_s28, 4  ;;  %s888_s29 = int_to_ptr.vmem [resolvable:$true] %s173_s29 }
  0x12   : > { %s616_s5 = scalar_lea.hbm %s1076_s1, 512 }
  0x13   : > { %p884_p11 = pnand %p538_p9, %p853_p1  ;;  %p617_p12 = scmp.ne.s32.totalorder %s1076_s1, %s616_s5 }
  0x14   : > { %p623_p5 = scmp.lt.u32.totalorder %s616_s5, %s1076_s1 }
  0x15   : > { %p618_p13 = pneg %p884_p11 }
  0x17   : > { %p619_p0 = pnand %p618_p13, %p617_p12 }
  0x19   : > { %p620_p3 = pneg %p619_p0 }
  0x1b   : > { %p625_p7 = pnand %p623_p5, %p620_p3 }
  0x1d   : > { %628 = shalt.err (!%p625_p7)
}
  0x1e   : > { %s629_s10 = scalar_lea.vmem %s877_s26, 512  ;;  %p637_p1 = scmp.lt.s32.totalorder %s877_s26, %s877_s26 }
  0x1f   : > { %p630_p9 = scmp.ne.s32.totalorder %s877_s26, %s629_s10  ;;  %p638_p12 = scmp.lt.s32.totalorder %s629_s10, %s629_s10 }
  0x21   : > { %p632_p10 = pnand %p630_p9, %p618_p13  ;;  %p639_p0 = por %p638_p12, %p637_p1 }
  0x23   : > { %p633_p6 = pneg %p632_p10 }
  0x25   : > { %p640_p4 = pnand %p639_p0, %p633_p6 }
  0x27   : > { %643 = shalt.err (!%p640_p4)
}
  0x28   : > { %s792_s11 = smov 128   ;;  %s793_s18 = smov 8  }
  0x29   : > { %541 = dma.hbm_to_vmem [thread:$0]  (!%p884_p11), %s1076_s1, 512, %s877_s26, [#allocation6], %s792_s11, %s792_s11, %s793_s18  }
  0x2a   : > { %s644_s4 = scalar_lea.hbm %s1077_s2, 128 }
  0x2b   : > { %p645_p1 = scmp.ne.s32.totalorder %s1077_s2, %s644_s4  ;;  %p651_p10 = scmp.lt.u32.totalorder %s644_s4, %s1077_s2 }
  0x2d   : > { %p647_p4 = pnand %p645_p1, %p618_p13 }
  0x2f   : > { %p648_p6 = pneg %p647_p4 }
  0x31   : > { %p653_p3 = pnand %p651_p10, %p648_p6 }
  0x33   : > { %656 = shalt.err (!%p653_p3)
}
  0x34   : > { %s657_s26 = scalar_lea.vmem %s888_s29, 128  ;;  %p665_p12 = scmp.lt.s32.totalorder %s888_s29, %s888_s29 }
  0x35   : > { %p658_p5 = scmp.ne.s32.totalorder %s888_s29, %s657_s26  ;;  %p666_p0 = scmp.lt.s32.totalorder %s657_s26, %s657_s26 }
  0x37   : > { %p660_p7 = pnand %p658_p5, %p618_p13  ;;  %p667_p1 = por %p666_p0, %p665_p12 }
  0x39   : > { %p661_p9 = pneg %p660_p7 }
  0x3b   : > { %p668_p4 = pnand %p667_p1, %p661_p9 }
  0x3d   : > { %671 = shalt.err (!%p668_p4)
}
  0x3e   : > { %544 = dma.hbm_to_vmem [thread:$0]  (!%p884_p11), %s1077_s2, 128, %s888_s29, [#allocation6]  }
  0x3f   : > { %s29_s11 = sadd.s32 1, %s784_s16  ;;  %s39_s18 = sadd.s32 1, %s776_s14 }
  0x40   : > { %p30_p13 = scmp.ge.s32.totalorder %s29_s11, 2  ;;  %p46_p6 = scmp.ne.s32.totalorder %s776_s14, %s772_s13 }
  0x41   : > { %p47_p10 = scmp.eq.s32.totalorder %s788_s17, 0  ;;  %p555_p3 = scmp.lt.s32.totalorder %s788_s17, 2 }
  0x42   : > { %s1102_s11 = smov (%p30_p13, %s29_s11), 0  ;;  %p952_p7 = por %p857_p2, %p46_p6 }
  0x43   : > { %p48_p5 = por %p47_p10, %p46_p6  ;;  %s36_s19 = ssub.s32 %s784_s16, %s1102_s11 }
  0x44   : > { %s1089_s27 = scalar_select %p952_p7, 1, 0 }
  0x45   : > { %s184_s25 = sand.u32 1, %s776_s14   ;;  %p37_p9 = scmp.eq.s32.totalorder %s36_s19, 0 }
  0x46   : > { %s492_s29 = sshll.u32 %s184_s25, 3  ;;  %s493_s28 = sshll.u32 %s784_s16, 7 }
  0x47   : > { %s961_s30 = scalar_select %p37_p9, %s776_s14, %s39_s18  }
  0x48   : > { %s966_s6 = scalar_lea.hbm %s1075_s0, %s493_s28  ;;  %s188_s21 = scalar_lea.vmem [#allocation2], %s492_s29 }
  0x49   : > { %s195_s7 = sshll.u32 %s188_s21, 4  ;;  %p970_p2 = pnand %p555_p3, %p48_p5  ;;  %s974_s7 = int_to_ptr.vmem [resolvable:$true] %s195_s7 }
  0x4a   : > { %s185_s26 = scalar_lea.sflag [#allocation3], %s184_s25  ;;  %s672_s9 = scalar_lea.hbm %s966_s6, 128 }
  0x4b   : > { %p673_p11 = scmp.ne.s32.totalorder %s966_s6, %s672_s9  ;;  %p674_p12 = pneg %p970_p2 }
  0x4c   : > { %s677_s19 = scalar_lea.hbm %s1075_s0, 256  ;;  %p678_p4 = scmp.lt.u32.totalorder %s966_s6, %s1075_s0 }
  0x4d   : > { %p675_p0 = pnand %p674_p12, %p673_p11  ;;  %p679_p13 = scmp.lt.u32.totalorder %s677_s19, %s672_s9 }
  0x4e   : > { %p681_p10 = scmp.lt.u32.totalorder %s672_s9, %s966_s6 }
  0x4f   : > { %p676_p1 = pneg %p675_p0  ;;  %p680_p6 = por %p679_p13, %p678_p4 }
  0x51   : > { %p682_p3 = por %p681_p10, %p680_p6 }
  0x53   : > { %p683_p5 = pnand %p682_p3, %p676_p1 }
  0x55   : > { %686 = shalt.err (!%p683_p5)
}
  0x56   : > { %s687_s25 = scalar_lea.vmem %s974_s7, 128  ;;  %s794_s4 = smov [#allocation2]  }
  0x57   : > { %p688_p9 = scmp.ne.s32.totalorder %s974_s7, %s687_s25  ;;  %s692_s5 = sshll.u32 %s794_s4, 4  ;;  %s693_s5 = int_to_ptr.vmem [resolvable:$false] %s692_s5 }
  0x58   : > { %s694_s21 = scalar_lea.vmem %s693_s5, 256  ;;  %p695_p7 = scmp.lt.s32.totalorder %s974_s7, %s693_s5 }
  0x59   : > { %p690_p11 = pnand %p688_p9, %p674_p12  ;;  %p696_p4 = scmp.lt.s32.totalorder %s694_s21, %s687_s25 }
  0x5b   : > { %p691_p0 = pneg %p690_p11  ;;  %p697_p13 = por %p696_p4, %p695_p7 }
  0x5d   : > { %p698_p6 = pnand %p697_p13, %p691_p0 }
  0x5f   : > { %701 = shalt.err (!%p698_p6)
}
  0x60   : > { %548 = dma.hbm_to_vmem [thread:$0]  (!%p970_p2), %s966_s6, 128, %s974_s7, %s185_s26  }
  0x61   : > { %204 = sbr.rel (%p873_p8) target bundleno = 374 (0x176), region = 32  ;;  %s1004_s9 = sand.u32 (!%p873_p8), 1, %s772_s13  }
  0x62   : > { %s495_s10 = sshll.u32 (!%p873_p8), %s1004_s9, 3  ;;  %s207_s18 = scalar_lea.sflag (!%p873_p8), [#allocation3], %s1004_s9 }
  0x63   : > { %s210_s19 = scalar_lea.vmem (!%p873_p8), [#allocation2], %s495_s10  ;;  %p1091_p7 = scmp.ne.s32.totalorder (!%p873_p8), %s1085_s22, 0 }
  0x68   : > { %755 = dma.done.wait (%p1091_p7), %s207_s18, 128  }
  0x69   : > { %757 = vsyncadd (%p1091_p7), %s207_s18, 4294967168  ;;  %p1092_p2 = scmp.ne.s32.totalorder %s1083_s20, 0 }
  0x6b   : > { %759 = dma.done.wait (%p1092_p2), [#allocation6], 640  }
  0x6c   : > { %761 = vsyncadd (%p1092_p2), [#allocation6], 4294966656  ;;  %v795_v0 = vmov 0.0|0.0   ;;  %vm796_vm0 = vmmov 0   ;;  %v797_v1 = vmov 0.0   ;;  %v241_v2 = vld [vmem:[#allocation5] sm:$0xff]  ;;  %v247_v9 = vlaneseq }
  0x6d   : > { %520 = vmatprep.subr.bf16.mxu0 %v795_v0  ;;  %517 = vmatprep.mubr.msk.f32.mxu0 %vm796_vm0, %v797_v1  ;;  %v242_v3 = vld [vmem:[#allocation5 + $0x8] sm:$0xff]  ;;  %v243_v4 = vld [vmem:[#allocation5 + $0x10] sm:$0xff]  ;;  %v244_v6 = vld [vmem:[#allocation5 + $0x18] sm:$0xff]  ;;  %vm251_vm1 = vcmask 261120   ;;  %s501_s20 = sshll.u32 %s780_s15, 7  ;;  %s240_s22 = scalar_lea.vmem [#allocation8], %s495_s10 }
  0x6e   : > { %v521_v5 = vpack.c.bf16 %v242_v3, %v241_v2  ;;  %v524_v7 = vpack.c.bf16 %v244_v6, %v243_v4  ;;  %v245_v8 = vld [vmem:[%s210_s19] sm:$0xff]  ;;  %v248_v10 = vshrl.u32 %v247_v9, 7  ;;  %v246_v12 = vld [vmem:[#allocation7] sm:$0xff]  ;;  %s384_s24 = sshll.u32 %s240_s22, 4  ;;  %s1025_s8 = scalar_lea.hbm %s1078_s3, %s501_s20  ;;  %s1027_s24 = int_to_ptr.vmem [resolvable:$true] %s384_s24 }
  0x6f   : > { %s370_s26 = scalar_lea.sflag [#allocation4], %s1004_s9  ;;  %s702_s15 = scalar_lea.vmem %s1027_s24, 128 }
  0x70   : > { %522 = vmatpush3.bf16.msra.mxu0 %v521_v5  ;;  %v249_v11 = vsub.s32 0, %v248_v10  ;;  %v349_v13 = vsub.s32 7, %v248_v10  ;;  %v354_v15 = vsub.s32 6, %v248_v10  ;;  %v327_v16 = vsub.s32 4, %v248_v10  ;;  %p703_p8 = scmp.ne.s32.totalorder %s1027_s24, %s702_s15  ;;  %p1093_p12 = scmp.ne.s32.totalorder %s1089_s27, 0 }
  0x71   : > { %523 = vmatprep.subr.bf16.mxu0 %v795_v0  ;;  %v360_v21 = vsub.s32 5, %v248_v10  ;;  %v332_v24 = vsub.s32 3, %v248_v10  ;;  %v338_v33 = vsub.s32 2, %v248_v10  ;;  %v344_v40 = vsub.s32 1, %v248_v10  ;;  %s798_s29 = smov [#allocation8]  }
  0x72   : > { %v250_v14 = vrot.slane %v246_v12, %v249_v11  ;;  %v350_v17 = vrot.slane %v246_v12, %v349_v13  ;;  %v355_v20 = vrot.slane %v246_v12, %v354_v15  ;;  %v328_v23 = vrot.slane %v246_v12, %v327_v16  ;;  %p704_p1 = pnand %p703_p8, %p1093_p12  ;;  %s706_s28 = sshll.u32 %s798_s29, 4  ;;  %s707_s28 = int_to_ptr.vmem [resolvable:$false] %s706_s28 }
  0x73   : > { %v361_v27 = vrot.slane %v246_v12, %v360_v21  ;;  %v333_v29 = vrot.slane %v246_v12, %v332_v24  ;;  %v339_v37 = vrot.slane %v246_v12, %v338_v33  ;;  %v345_v42 = vrot.slane %v246_v12, %v344_v40  ;;  %s708_s25 = scalar_lea.vmem %s707_s28, 256  ;;  %p709_p3 = scmp.lt.s32.totalorder %s1027_s24, %s707_s28 }
  0x74   : > { %525 = vmatpush3.bf16.msra.mxu0 %v524_v7  ;;  %p705_p10 = pneg %p704_p1  ;;  %p710_p5 = scmp.lt.s32.totalorder %s708_s25, %s702_s15 }
  0x76   : > { %p711_p9 = por %p710_p5, %p709_p3 }
  0x77   : > { %518 = vmatmul.mubr.msk.f32.vlgmr.msra.gmra.mrb[0].mxu0 %vm251_vm1, %v245_v8 }
  0x78   : > { %p712_p11 = pnand %p711_p9, %p705_p10 }
 0x14a   : > { %v321_v18 = vpop.f32.mrb[0].mxu0 }
 0x14b   : > { %v322_v19 = vadd.f32 %v321_v18, %v250_v14  ;;  %v519_v22 = vpop.f32.mrb[1].mxu0 }
 0x14d   : > { %v351_v25 = vmul.f32 %v350_v17, %v322_v19  ;;  %v329_v28 = vmul.f32 %v328_v23, %v322_v19 }
 0x14f   : > { %v356_v26 = vadd.f32 %v355_v20, %v351_v25  ;;  %v334_v32 = vadd.f32 %v333_v29, %v329_v28 }
 0x151   : > { %v357_v30 = vmul.f32 %v356_v26, %v322_v19  ;;  %v335_v36 = vmul.f32 %v334_v32, %v322_v19 }
 0x153   : > { %v362_v31 = vadd.f32 %v361_v27, %v357_v30  ;;  %v340_v39 = vadd.f32 %v339_v37, %v335_v36 }
 0x155   : > { %v363_v34 = vmul.f32 %v362_v31, %v322_v19  ;;  %v341_v41 = vmul.f32 %v340_v39, %v322_v19 }
 0x157   : > { %v364_v35 = vand.u32 2147483647, %v363_v34  ;;  %v346_v43 = vadd.f32 %v345_v42, %v341_v41 }
 0x159   : > { %v365_v38 = vadd.f32 1.0, %v364_v35 }
 0x15b   : > { %614 = vrcp.f32 %v365_v38 }
 0x165   : > { %v615_v44 = vpop.eup %614 }
 0x166   : > { %v367_v45 = vmul.f32 %v615_v44, %v346_v43 }
 0x168   : > { %368 = vst.msk [vmem:[%s240_s22] sm:$0xff] %vm251_vm1, %v367_v45 }
 0x169   : > { %715 = shalt.err (!%p712_p11)
}
 0x16a   : > { %s716_s4 = scalar_lea.hbm %s1025_s8, 128  ;;  %s720_s9 = scalar_lea.hbm %s1078_s3, 256 }
 0x16b   : > { %p717_p0 = scmp.ne.s32.totalorder %s1025_s8, %s716_s4  ;;  %p721_p6 = scmp.lt.u32.totalorder %s1025_s8, %s1078_s3 }
 0x16c   : > { %p722_p7 = scmp.lt.u32.totalorder %s720_s9, %s716_s4  ;;  %p724_p8 = scmp.lt.u32.totalorder %s716_s4, %s1025_s8 }
 0x16d   : > { %p718_p4 = pnand %p717_p0, %p1093_p12 }
 0x16e   : > { %p723_p2 = por %p722_p7, %p721_p6 }
 0x16f   : > { %p719_p13 = pneg %p718_p4 }
 0x170   : > { %p725_p1 = por %p724_p8, %p723_p2 }
 0x172   : > { %p726_p10 = pnand %p725_p1, %p719_p13 }
 0x174   : > { %729 = shalt.err (!%p726_p10)
}
 0x175   : > { %536 = dma.vmem_to_hbm [thread:$0]  (%p1093_p12), %s1027_s24, 128, %s1025_s8, %s370_s26  }
 0x176 PF: > { %s396_s19 = sand.u32 1, %s768_s12   ;;  %p1094_p3 = scmp.ne.s32.totalorder %s1086_s23, 0 }
 0x177   : > { %p1095_p5 = scmp.ge.s32.totalorder %s788_s17, 2  ;;  %s397_s20 = scalar_lea.sflag [#allocation4], %s396_s19 }
 0x179   : > { %p550_p9 = pnand %p1095_p5, %p1094_p3 }
 0x17b   : > { %763 = dma.done.wait (!%p550_p9), %s397_s20, 128  }
 0x17c   : > { %765 = vsyncadd (!%p550_p9), %s397_s20, 4294967168  ;;  %s20_s17 = sadd.s32 1, %s788_s17   ;;  %s1096_s12 = smov %s772_s13 }
 0x17d   : > { %p17_p11 = scmp.ge.s32.totalorder %s20_s17, 4   ;;  %s1097_s13 = smov %s776_s14 }
 0x17e   : > { %s1098_s14 = smov %s961_s30  ;;  %s1099_s15 = smov %s784_s16 }
 0x17f   : > { %s1100_s16 = smov %s1102_s11  ;;  %19 = sbr.rel (!%p17_p11) target bundleno = 7 (0x7), region = 87 }
 0x186   :  { %402 = vsyncpa [#allocation3], 1 }
 0x187   :  { %404 = vsyncpa [#allocation3 + $0x1], 1 }
 0x188   :  { %405 = vsyncpa [#allocation6], 1 }
 0x189   :  { %406 = vsyncpa [#allocation4], 1 }
 0x18a   :  { %408 = vsyncpa [#allocation4 + $0x1], 1 }

</bundles_post_ra>
